<compile_context>
chip_gen: v7x
topology: tpu7x:2x2x1
jax: 0.10.0
libtpu: 0.0.40
codegen_flags: <defaults>
</compile_context>

<pallas_src>
import functools

import jax
import jax.numpy as jnp
from jax import lax
from jax.experimental import pallas as pl
from jax.experimental.pallas import tpu as pltpu

EPS = 1e-5
NEG_SLOPE = 0.2


def _round_up(x, m):
    return (x + m - 1) // m * m


def _num_tensorcores():
    # Defensive core-count probe: only used to decide whether a C_out split
    # buys a second TensorCore (v7x / megacore) at N == 1.
    try:
        d = jax.devices()[0]
        for attr in ("num_cores", "core_count", "num_cores_per_chip"):
            v = getattr(d, attr, None)
            if isinstance(v, int) and 1 <= v <= 8:
                return v
    except Exception:
        pass
    return 1


def _vmem_capacity_bytes():
    try:
        cap = getattr(pltpu.get_tpu_info(), "vmem_capacity_bytes", None)
        if cap:
            return int(cap)
    except Exception:
        pass
    return 64 << 20  # conservative default (v7x-sized)


def _cnn_block_kernel(x_ref, w_ref, mask_ref, o_ref, patch_ref, *,
                      c4, w_half, pp_pad, chunk, n_valid, norm):
    # x_ref:     (1, C4, Pf_pad)    bf16  space-to-depth input slab (one batch elem)
    # w_ref:     (C_tile, K)        bf16  conv weights, K = 4*C4 = C_in*16
    # mask_ref:  (1, Pp_pad)        f32   1.0 on valid output columns, 0.0 on the
    #                                     per-row wrap column / tail padding
    # o_ref:     (1, C_tile, Pp_pad)      output block (f32 or bf16)
    # patch_ref: (K, Pp_pad)        bf16  VMEM scratch: fused in-kernel im2col
    c_tile = o_ref.shape[1]
    n_chunks = pp_pad // chunk

    # ---- fused im2col: 4 static tap slices of the resident slab ------------
    # conv(k=4, s=2) on x == conv(k=2, s=1) on space-to-depth(x); each of the
    # four (dh, dw) taps is a contiguous slice of the flattened slab at a
    # *static* offset {0, 1, W_half, W_half+1}.
    for t, off in enumerate((0, 1, w_half, w_half + 1)):
        patch_ref[t * c4:(t + 1) * c4, :] = x_ref[0, :, off:off + pp_pad]

    def _conv_chunk(i):
        start = pl.multiple_of(i * chunk, chunk)          # lane-aligned start
        y = jnp.dot(w_ref[...], patch_ref[:, pl.ds(start, chunk)],
                    preferred_element_type=jnp.float32)   # (C_tile, chunk) f32
        y = y * mask_ref[:, pl.ds(start, chunk)]          # zero invalid columns
        return start, y

    if norm:
        def body(i, carry):
            s, ss = carry
            start, y = _conv_chunk(i)
            o_ref[0, :, pl.ds(start, chunk)] = y.astype(o_ref.dtype)
            s = s + jnp.sum(y, axis=1, keepdims=True)
            ss = ss + jnp.sum(y * y, axis=1, keepdims=True)
            return s, ss

        s0 = jnp.zeros((c_tile, 1), jnp.float32)
        ss0 = jnp.zeros((c_tile, 1), jnp.float32)
        s, ss = lax.fori_loop(0, n_chunks, body, (s0, ss0))

        # TODO(synk): single-pass E[x^2]-E[x]^2 variance can cancel for channels
        # with |mean| >> std; fine in f32 for typical activations.
        inv_n = 1.0 / float(n_valid)
        mean = s * inv_n
        var = jnp.maximum(ss * inv_n - mean * mean, 0.0)   # biased variance
        inv_std = lax.rsqrt(var + EPS)

        def epilogue(i, carry):
            start = pl.multiple_of(i * chunk, chunk)
            y = o_ref[0, :, pl.ds(start, chunk)].astype(jnp.float32)
            yn = (y - mean) * inv_std
            o_ref[0, :, pl.ds(start, chunk)] = jnp.where(
                yn >= 0, yn, NEG_SLOPE * yn).astype(o_ref.dtype)
            return carry

        lax.fori_loop(0, n_chunks, epilogue, 0)
    else:
        def body(i, carry):
            start, y = _conv_chunk(i)
            y = jnp.where(y >= 0, y, NEG_SLOPE * y)
            o_ref[0, :, pl.ds(start, chunk)] = y.astype(o_ref.dtype)
            return carry

        lax.fori_loop(0, n_chunks, body, 0)


@functools.partial(jax.jit, static_argnames=("stride", "padding", "norm", "out_dtype"))
def cnn_block_forward(x, weight, stride=2, padding=1, norm=True, out_dtype=jnp.float32):
    """x: (N, C_in, H, W); weight: (C_out, C_in, 4, 4). Returns (N, C_out, H/2, W/2)."""
    n, c_in, h, w = x.shape
    c_out, c_in_w, kh, kw = weight.shape
    assert c_in_w == c_in
    # TODO(synk): only the CNNBlock default config (k=4, s=2, p=1 reflect, even H/W)
    # uses the fused space-to-depth path; other configs would need a generic
    # im2col fallback.
    assert kh == 4 and kw == 4 and stride == 2 and padding == 1
    assert h % 2 == 0 and w % 2 == 0

    h_out, w_out = h // 2, w // 2
    h_half, w_half = (h + 2) // 2, (w + 2) // 2   # padded-image half sizes
    c4 = c_in * 4
    k_len = c_in * 16
    pf = h_half * w_half                          # flattened s2d spatial size
    p_prime = h_out * w_half                      # computed columns (incl. wrap col)
    n_valid = h_out * w_out                       # true per-instance spatial count
    out_bytes = jnp.dtype(out_dtype).itemsize

    vmem_cap = _vmem_capacity_bytes()

    # --- C_out tiling: split only when it buys a second TensorCore (N == 1 on a
    #     multi-core chip); never on single-core v5e/v6e (avoids re-streaming x).
    c_tile = c_out
    if n == 1 and c_out % 32 == 0 and _num_tensorcores() >= 2:
        c_tile = c_out // 2
    pp_est = _round_up(p_prime, 128)
    budget = max(8 << 20, vmem_cap // 4)
    while c_tile > 32 and c_tile % 32 == 0 and 2 * c_tile * pp_est * out_bytes > budget:
        c_tile //= 2
    n_ct = c_out // c_tile

    # --- lane-chunk size for the in-kernel compute/epilogue loops (bounds the
    #     (c_tile, chunk) f32 temporary to ~256 KiB), multiple of 128.
    chunk = max(128, min(2048, (256 * 1024) // max(c_tile * 4, 1) // 128 * 128))
    chunk = min(chunk, _round_up(p_prime, 128))
    pp_pad = _round_up(p_prime, chunk)
    pf_pad = _round_up(max(pf, pp_pad + w_half + 1), 128)

    # --- wrapper-side prep (cheap, ~1x input traffic): reflect pad + stride-2
    #     space-to-depth + spatial flatten, emitted directly as bf16.
    # TODO(synk): the reflect pad / phase split itself stays a (1x-traffic)
    # wrapper XLA op; pulling it into the kernel would need in-kernel strided
    # lane gathers for marginal gain.
    xp = jnp.pad(x, ((0, 0), (0, 0), (padding, padding), (padding, padding)),
                 mode="reflect")
    xflat = (xp.reshape(n, c_in, h_half, 2, w_half, 2)
               .transpose(0, 1, 3, 5, 2, 4)
               .reshape(n, c4, pf)
               .astype(jnp.bfloat16))
    xflat = jnp.pad(xflat, ((0, 0), (0, 0), (0, pf_pad - pf)))

    # Weights -> (C_out, K) with K ordered (tap t = dh*2+dw, c, di, dj) to match
    # the in-kernel patch layout.
    w_k = (weight.reshape(c_out, c_in, 2, 2, 2, 2)
                 .transpose(0, 2, 4, 1, 3, 5)
                 .reshape(c_out, k_len)
                 .astype(jnp.bfloat16))

    # Valid-column mask: zero on the wrap column of each output row and on the
    # tail padding, so masked columns contribute nothing to the statistics.
    pidx = jnp.arange(pp_pad, dtype=jnp.int32)
    mask = ((pidx < p_prime) & ((pidx % w_half) < w_out)).astype(jnp.float32)
    mask = mask.reshape(1, pp_pad)

    kernel = functools.partial(
        _cnn_block_kernel, c4=c4, w_half=w_half, pp_pad=pp_pad, chunk=chunk,
        n_valid=n_valid, norm=norm)

    # Explicit VMEM budget, per generation (double-buffered pipeline blocks +
    # single-buffered patch scratch + rough temporaries).
    vmem_need = (2 * c4 * pf_pad * 2                  # input slab, bf16
                 + 2 * c_tile * k_len * 2             # weight tile, bf16
                 + 2 * pp_pad * 4                     # mask, f32
                 + 2 * c_tile * pp_pad * out_bytes    # resident output block
                 + k_len * pp_pad * 2                 # patch scratch, bf16
                 + 4 * c_tile * chunk * 4)            # in-kernel temporaries
    vmem_limit = int(min(max(2 * vmem_need, 32 << 20), int(vmem_cap * 0.75)))
    # TODO(synk): very large spatial outputs (P of several hundred K columns)
    # would need an extra P-tile grid axis instead of a whole-image resident block.

    cost = pl.CostEstimate(
        flops=2 * n * c_out * k_len * pp_pad,
        transcendentals=n * c_out,
        bytes_accessed=(n * c4 * pf_pad * 2 + n_ct * c_out * k_len * 2
                        + n * c_out * pp_pad * out_bytes),
    )

    out = pl.pallas_call(
        kernel,
        out_shape=jax.ShapeDtypeStruct((n, c_out, pp_pad), out_dtype),
        grid_spec=pltpu.PrefetchScalarGridSpec(
            num_scalar_prefetch=0,
            grid=(n_ct, n),           # c-tiles outermost: weights re-DMA'd n_ct times
            in_specs=[
                pl.BlockSpec((1, c4, pf_pad), lambda ci, b: (b, 0, 0)),
                pl.BlockSpec((c_tile, k_len), lambda ci, b: (ci, 0)),
                pl.BlockSpec((1, pp_pad), lambda ci, b: (0, 0)),
            ],
            out_specs=pl.BlockSpec((1, c_tile, pp_pad), lambda ci, b: (b, ci, 0)),
            scratch_shapes=[pltpu.VMEM((k_len, pp_pad), jnp.bfloat16)],
        ),
        compiler_params=pltpu.CompilerParams(
            dimension_semantics=("parallel", "parallel"),
            vmem_limit_bytes=vmem_limit,
        ),
        cost_estimate=cost,
    )(xflat, w_k, mask)

    # (N, C_out, P') is row-major over (H_out, W_half): drop tail padding and the
    # per-row wrap column, reshape to NCHW.
    out = out[:, :, :p_prime].reshape(n, c_out, h_out, w_half)[:, :, :, :w_out]
    return out


def _reference(x, weight, norm=True):
    """Pure-JAX f32 reference for correctness check."""
    xp = jnp.pad(x, ((0, 0), (0, 0), (1, 1), (1, 1)), mode="reflect")
    y = lax.conv_general_dilated(
        xp, weight, window_strides=(2, 2), padding="VALID",
        dimension_numbers=("NCHW", "OIHW", "NCHW"))
    if norm:
        mean = jnp.mean(y, axis=(2, 3), keepdims=True)
        var = jnp.mean((y - mean) ** 2, axis=(2, 3), keepdims=True)
        y = (y - mean) * lax.rsqrt(var + EPS)
    return jnp.where(y >= 0, y, NEG_SLOPE * y)


if __name__ == "__main__":
    key = jax.random.PRNGKey(0)
    kx, kw_key = jax.random.split(key)

    N, C_IN, C_OUT, H, W = 2, 4, 8, 16, 16
    x = jax.random.normal(kx, (N, C_IN, H, W), dtype=jnp.float32)
    weight = jax.random.normal(kw_key, (C_OUT, C_IN, 4, 4), dtype=jnp.float32) * 0.1

    # norm=True (default CNNBlock)
    out = jax.block_until_ready(cnn_block_forward(x, weight))
    assert out.shape == (N, C_OUT, H // 2, W // 2), out.shape
    ref = _reference(x, weight)
    # bf16 MXU inputs (f32 accumulation + f32 norm math) -> loosened tolerance.
    assert jnp.allclose(out, ref, atol=5e-2, rtol=5e-2), float(
        jnp.max(jnp.abs(out - ref)))

    # norm=False (Conv + LeakyReLU only)
    out_nn = jax.block_until_ready(cnn_block_forward(x, weight, norm=False))
    ref_nn = _reference(x, weight, norm=False)
    assert jnp.allclose(out_nn, ref_nn, atol=5e-2, rtol=5e-2), float(
        jnp.max(jnp.abs(out_nn - ref_nn)))

    print("KERNEL_OK")
</pallas_src>

<mosaic_0001>
module attributes {stable_mosaic.version = 11 : i64} {
  func.func @_cnn_block_kernel(%arg0: i32, %arg1: i32, %arg2: memref<1x16x256xbf16, #tpu.memory_space<vmem>>, %arg3: memref<8x64xbf16, #tpu.memory_space<vmem>>, %arg4: memref<1x128xf32, #tpu.memory_space<vmem>>, %arg5: memref<1x8x128xf32, #tpu.memory_space<vmem>>, %arg6: memref<64x128xbf16, #tpu.memory_space<vmem>>) attributes {dimension_semantics = [#tpu.dimension_semantics<parallel>, #tpu.dimension_semantics<parallel>], iteration_bounds = array<i64: 1, 2>, scalar_prefetch = 0 : i64, scratch_operands = 1 : i64, tpu.core_type = #tpu.core_type<tc>, window_params = [{transform_indices = @transform_0, window_bounds = array<i64: 1, 16, 256>}, {transform_indices = @transform_1, window_bounds = array<i64: 8, 64>}, {pipeline_mode = #tpu.pipeline_mode<synchronous>, transform_indices = @transform_2, window_bounds = array<i64: 1, 128>}, {transform_indices = @transform_3, window_bounds = array<i64: 1, 8, 128>}]} {
    %c0 = arith.constant 0 : index
    %c0_0 = arith.constant 0 : index
    %c0_1 = arith.constant 0 : index
    %0 = vector.load %arg2[%c0, %c0_0, %c0_1] : memref<1x16x256xbf16, #tpu.memory_space<vmem>>, vector<1x16x128xbf16>
    %1 = vector.shape_cast %0 : vector<1x16x128xbf16> to vector<16x128xbf16>
    %c0_2 = arith.constant 0 : index
    %c0_3 = arith.constant 0 : index
    %2 = vector.load %arg6[%c0_2, %c0_3] : memref<64x128xbf16, #tpu.memory_space<vmem>>, vector<16x128xbf16>
    tpu.vector_store %arg6[%c0_2, %c0_3], %1 {strides = array<i32>} : memref<64x128xbf16, #tpu.memory_space<vmem>>, vector<16x128xbf16>,
    %c0_4 = arith.constant 0 : index
    %c0_5 = arith.constant 0 : index
    %c1 = arith.constant 1 : index
    %3 = vector.load %arg2[%c0_4, %c0_5, %c1] : memref<1x16x256xbf16, #tpu.memory_space<vmem>>, vector<1x16x128xbf16>
    %4 = vector.shape_cast %3 : vector<1x16x128xbf16> to vector<16x128xbf16>
    %c16 = arith.constant 16 : index
    %c0_6 = arith.constant 0 : index
    %5 = vector.load %arg6[%c16, %c0_6] : memref<64x128xbf16, #tpu.memory_space<vmem>>, vector<16x128xbf16>
    tpu.vector_store %arg6[%c16, %c0_6], %4 {strides = array<i32>} : memref<64x128xbf16, #tpu.memory_space<vmem>>, vector<16x128xbf16>,
    %c0_7 = arith.constant 0 : index
    %c0_8 = arith.constant 0 : index
    %c9 = arith.constant 9 : index
    %6 = vector.load %arg2[%c0_7, %c0_8, %c9] : memref<1x16x256xbf16, #tpu.memory_space<vmem>>, vector<1x16x128xbf16>
    %7 = vector.shape_cast %6 : vector<1x16x128xbf16> to vector<16x128xbf16>
    %c32 = arith.constant 32 : index
    %c0_9 = arith.constant 0 : index
    %8 = vector.load %arg6[%c32, %c0_9] : memref<64x128xbf16, #tpu.memory_space<vmem>>, vector<16x128xbf16>
    tpu.vector_store %arg6[%c32, %c0_9], %7 {strides = array<i32>} : memref<64x128xbf16, #tpu.memory_space<vmem>>, vector<16x128xbf16>,
    %c0_10 = arith.constant 0 : index
    %c0_11 = arith.constant 0 : index
    %c10 = arith.constant 10 : index
    %9 = vector.load %arg2[%c0_10, %c0_11, %c10] : memref<1x16x256xbf16, #tpu.memory_space<vmem>>, vector<1x16x128xbf16>
    %10 = vector.shape_cast %9 : vector<1x16x128xbf16> to vector<16x128xbf16>
    %c48 = arith.constant 48 : index
    %c0_12 = arith.constant 0 : index
    %11 = vector.load %arg6[%c48, %c0_12] : memref<64x128xbf16, #tpu.memory_space<vmem>>, vector<16x128xbf16>
    tpu.vector_store %arg6[%c48, %c0_12], %10 {strides = array<i32>} : memref<64x128xbf16, #tpu.memory_space<vmem>>, vector<16x128xbf16>,
    %cst = arith.constant 0.000000e+00 : f32
    %12 = vector.broadcast %cst : f32 to vector<8x1xf32>
    %cst_13 = arith.constant 0.000000e+00 : f32
    %13 = vector.broadcast %cst_13 : f32 to vector<8x1xf32>
    %c0_i32 = arith.constant 0 : i32
    %c128_i32 = arith.constant 128 : i32
    %14 = arith.muli %c0_i32, %c128_i32 : i32
    %15 = tpu.assume_multiple %14, 128 : i32
    %c0_14 = arith.constant 0 : index
    %c0_15 = arith.constant 0 : index
    %16 = vector.load %arg3[%c0_14, %c0_15] : memref<8x64xbf16, #tpu.memory_space<vmem>>, vector<8x64xbf16>
    %c0_16 = arith.constant 0 : index
    %17 = arith.index_cast %15 : i32 to index
    %18 = vector.load %arg6[%c0_16, %17] : memref<64x128xbf16, #tpu.memory_space<vmem>>, vector<64x128xbf16>
    %cst_17 = arith.constant dense<0.000000e+00> : vector<8x128xf32>
    %19 = tpu.matmul %16, %18, %cst_17 {dimension_numbers = #tpu.dot_dimension_numbers<[1], [0], [0], [1], [0, 0, 1, 1], [], []>} : vector<8x64xbf16>, vector<64x128xbf16>, vector<8x128xf32> -> vector<8x128xf32>
    %c0_18 = arith.constant 0 : index
    %20 = arith.index_cast %15 : i32 to index
    %21 = vector.load %arg4[%c0_18, %20] : memref<1x128xf32, #tpu.memory_space<vmem>>, vector<1x128xf32>
    %22 = vector.broadcast %21 : vector<1x128xf32> to vector<8x128xf32>
    %23 = arith.mulf %19, %22 : vector<8x128xf32>
    %c0_19 = arith.constant 0 : index
    %c0_20 = arith.constant 0 : index
    %24 = arith.index_cast %15 : i32 to index
    %25 = vector.load %arg5[%c0_19, %c0_20, %24] : memref<1x8x128xf32, #tpu.memory_space<vmem>>, vector<1x8x128xf32>
    %26 = vector.shape_cast %25 : vector<1x8x128xf32> to vector<8x128xf32>
    %27 = vector.shape_cast %23 : vector<8x128xf32> to vector<1x8x128xf32>
    tpu.vector_store %arg5[%c0_19, %c0_20, %24], %27 {strides = array<i32>} : memref<1x8x128xf32, #tpu.memory_space<vmem>>, vector<1x8x128xf32>,
    %cst_21 = arith.constant dense<0.000000e+00> : vector<8xf32>
    %28 = vector.multi_reduction <add>, %23, %cst_21 [1] : vector<8x128xf32> to vector<8xf32>
    %29 = vector.shape_cast %28 : vector<8xf32> to vector<8x1xf32>
    %30 = arith.addf %12, %29 : vector<8x1xf32>
    %31 = arith.mulf %23, %23 : vector<8x128xf32>
    %cst_22 = arith.constant dense<0.000000e+00> : vector<8xf32>
    %32 = vector.multi_reduction <add>, %31, %cst_22 [1] : vector<8x128xf32> to vector<8xf32>
    %33 = vector.shape_cast %32 : vector<8xf32> to vector<8x1xf32>
    %34 = arith.addf %13, %33 : vector<8x1xf32>
    %c1_i32 = arith.constant 1 : i32
    %cst_23 = arith.constant 1.562500e-02 : f32
    %35 = vector.broadcast %cst_23 : f32 to vector<8x1xf32>
    %36 = arith.mulf %30, %35 : vector<8x1xf32>
    %cst_24 = arith.constant 1.562500e-02 : f32
    %37 = vector.broadcast %cst_24 : f32 to vector<8x1xf32>
    %38 = arith.mulf %34, %37 : vector<8x1xf32>
    %39 = arith.mulf %36, %36 : vector<8x1xf32>
    %40 = arith.subf %38, %39 : vector<8x1xf32>
    %cst_25 = arith.constant 0.000000e+00 : f32
    %41 = vector.broadcast %cst_25 : f32 to vector<8x1xf32>
    %42 = arith.maximumf %40, %41 : vector<8x1xf32>
    %cst_26 = arith.constant 9.99999974E-6 : f32
    %43 = vector.broadcast %cst_26 : f32 to vector<8x1xf32>
    %44 = arith.addf %42, %43 : vector<8x1xf32>
    %45 = math.rsqrt %44 : vector<8x1xf32>
    %c0_i32_27 = arith.constant 0 : i32
    %c128_i32_28 = arith.constant 128 : i32
    %46 = arith.muli %c0_i32_27, %c128_i32_28 : i32
    %47 = tpu.assume_multiple %46, 128 : i32
    %c0_29 = arith.constant 0 : index
    %c0_30 = arith.constant 0 : index
    %48 = arith.index_cast %47 : i32 to index
    %49 = vector.load %arg5[%c0_29, %c0_30, %48] : memref<1x8x128xf32, #tpu.memory_space<vmem>>, vector<1x8x128xf32>
    %50 = vector.shape_cast %49 : vector<1x8x128xf32> to vector<8x128xf32>
    %51 = vector.broadcast %36 : vector<8x1xf32> to vector<8x128xf32>
    %52 = arith.subf %50, %51 : vector<8x128xf32>
    %53 = vector.broadcast %45 : vector<8x1xf32> to vector<8x128xf32>
    %54 = arith.mulf %52, %53 : vector<8x128xf32>
    %cst_31 = arith.constant 0.000000e+00 : f32
    %55 = vector.broadcast %cst_31 : f32 to vector<8x128xf32>
    %56 = arith.cmpf oge, %54, %55 : vector<8x128xf32>
    %cst_32 = arith.constant 2.000000e-01 : f32
    %57 = vector.broadcast %cst_32 : f32 to vector<8x128xf32>
    %58 = arith.mulf %57, %54 : vector<8x128xf32>
    %59 = arith.select %56, %54, %58 : vector<8x128xi1>, vector<8x128xf32>
    %c0_33 = arith.constant 0 : index
    %c0_34 = arith.constant 0 : index
    %60 = arith.index_cast %47 : i32 to index
    %61 = vector.load %arg5[%c0_33, %c0_34, %60] : memref<1x8x128xf32, #tpu.memory_space<vmem>>, vector<1x8x128xf32>
    %62 = vector.shape_cast %61 : vector<1x8x128xf32> to vector<8x128xf32>
    %63 = vector.shape_cast %59 : vector<8x128xf32> to vector<1x8x128xf32>
    tpu.vector_store %arg5[%c0_33, %c0_34, %60], %63 {strides = array<i32>} : memref<1x8x128xf32, #tpu.memory_space<vmem>>, vector<1x8x128xf32>,
    %c1_i32_35 = arith.constant 1 : i32
    return
  }
  func.func @transform_0(%arg0: i32, %arg1: i32) -> (i32, i32, i32) {
    %c0_i32 = arith.constant 0 : i32
    %c0_i32_0 = arith.constant 0 : i32
    %c0_i32_1 = arith.constant 0 : i32
    return %arg1, %c0_i32, %c0_i32_0 : i32, i32, i32
  }
  func.func @transform_1(%arg0: i32, %arg1: i32) -> (i32, i32) {
    %c0_i32 = arith.constant 0 : i32
    %c0_i32_0 = arith.constant 0 : i32
    return %arg0, %c0_i32 : i32, i32
  }
  func.func @transform_2(%arg0: i32, %arg1: i32) -> (i32, i32) {
    %c0_i32 = arith.constant 0 : i32
    %c0_i32_0 = arith.constant 0 : i32
    %c0_i32_1 = arith.constant 0 : i32
    return %c0_i32, %c0_i32_0 : i32, i32
  }
  func.func @transform_3(%arg0: i32, %arg1: i32) -> (i32, i32, i32) {
    %c0_i32 = arith.constant 0 : i32
    %c0_i32_0 = arith.constant 0 : i32
    return %arg1, %arg0, %c0_i32 : i32, i32, i32
  }
}

</mosaic_0001>

<bundles_post_ra>
// kernel: cnn_block_forward.1
= control target key start
LH: loop header
LB: loop body
LE: loop exit
PB: predicated region body
PF: predicated region fallthrough
CT: control target
= control target key end

     0   :  { %s558_s12 = smov 0   ;;  %s560_s13 = smov 0   ;;  %s601_s0 = inlined_call_operand.vmem [shape: bf16[2,16,256], index: 0, kind: input, shape index: {}]   ;;  %s602_s1 = inlined_call_operand.vmem [shape: bf16[8,64], index: 1, kind: input, shape index: {}]   ;;  %s603_s2 = inlined_call_operand.vmem [shape: f32[1,128], index: 2, kind: input, shape index: {}]   ;;  %s604_s3 = inlined_call_operand.vmem [shape: f32[2,8,128], index: 3, kind: output, shape index: {}]  }
   0x1   :  { %s562_s14 = smov 0  }
   0x2 LB: > { %s22_s15 = sadd.s32 1, %s527_s13  ;;  %p441_p0 = scmp.ge.s32.totalorder %s531_s14, 1  ;;  %s531_s14 = sphi %s562_s14, %s13_s14   ;;  %s527_s13 = sphi %s560_s13, %s606_s13   ;;  %s523_s12 = sphi %s558_s12, %s605_s12  }
   0x3   : > { %p23_p1 = scmp.ge.s32.totalorder %s22_s15, 2  ;;  %p160_p2 = scmp.lt.s32.totalorder %s531_s14, 3 }
   0x5   : > { %s608_s15 = smov (%p23_p1, %s22_s15), 0  ;;  %p161_p3 = pnand %p441_p0, %p160_p2 }
   0x6   : > { %p190_p4 = scmp.lt.s32.totalorder (!%p161_p3), %s523_s12, 1  ;;  %v533_v0 = vmov (!%p161_p3), 0.0   ;;  %s534_s20 = smov (!%p161_p3), 119   ;;  %vm536_vm0 = vmmov (!%p161_p3), 0   ;;  %vm230_vm1 = vcmask (!%p161_p3), 1039360   ;;  %vm248_vm2 = vcmask (!%p161_p3), 973824  }
   0x7   : > { %164 = sbr.rel (%p161_p3) target bundleno = 532 (0x214), region = 32  ;;  %462 = vmatprep.subr.bf16.mxu0 (!%p161_p3), %v533_v0  ;;  %s535_s21 = smov (!%p161_p3), 127   ;;  %470 = vmatprep.mubr.msk.bf16.mxu0 (!%p161_p3), %vm536_vm0, %v533_v0  ;;  %vm266_vm3 = vcmask (!%p161_p3), 965632   ;;  %v270_v13 = vld [vmem:[%s602_s1] sm:$0xf] (!%p161_p3)  ;;  %vm275_vm4 = vcmask (!%p161_p3), 523264  }
   0x8   : > { %s537_s22 = smov (!%p161_p3), 118   ;;  %v453_v14 = vld [vmem:[%s603_s2] ss:$0 sm:$0xff] (!%p161_p3) }
   0xe   : > { %s610_s12 = smov (!%p190_p4, %s523_s12), 1 }
   0xf   : > { %s456_s16 = sshll.u32 %s610_s12, 4  ;;  %s444_s27 = sshll.u32 %s610_s12, 3 }
  0x10   : > { %s194_s19 = scalar_lea.vmem %s601_s0, %s456_s16  ;;  %s205_s30 = scalar_lea.vmem %s604_s3, %s444_s27 }
  0x11   : > { %v503_v1 = vld [vmem:[%s194_s19] ss:$8 sps:$4 sm:$0xff]   ;;  %v505_v2 = vld [vmem:[%s194_s19 + $0x4] ss:$8 sps:$4 sm:$0xff]  }
  0x12   : > { %244 = vrot.lane.b32.xlu1 %v503_v1, %s534_s20  ;;  %226 = vrot.lane.b32.xlu0 %v503_v1, %s535_s21  ;;  %v506_v3 = vld [vmem:[%s194_s19] ss:$8 sps:$4 sm:$0xff]  }
  0x13   : > { %463 = vmatpush3.bf16.msra.mxu0 %v506_v3 }
  0x14   : > { %464 = vmatprep.subr.bf16.mxu0 %v533_v0 }
  0x16   : > { %246 = vrot.lane.b32.xlu1 %v505_v2, %s534_s20  ;;  %228 = vrot.lane.b32.xlu0 %v505_v2, %s535_s21 }
  0x1a   : > { %264 = vrot.lane.b32.xlu1 %v505_v2, %s537_s22  ;;  %262 = vrot.lane.b32.xlu0 %v503_v1, %s537_s22 }
  0x84   : > { %v245_v4 = vpop.permute.xlu1 %244  ;;  %v227_v5 = vpop.permute.xlu0 %226 }
  0x88   : > { %v247_v6 = vpop.permute.xlu1 %246  ;;  %v229_v7 = vpop.permute.xlu0 %228 }
  0x89   : > { %v231_v8 = vsel %vm230_vm1, %v227_v5, %v229_v7  ;;  %v249_v11 = vsel %vm248_vm2, %v245_v4, %v247_v6 }
  0x8a   : > { %465 = vmatpush3.bf16.msra.mxu0 %v231_v8 }
  0x8b   : > { %466 = vmatprep.subr.bf16.mxu0 %v533_v0 }
  0x8c   : > { %v265_v9 = vpop.permute.xlu1 %264  ;;  %v263_v10 = vpop.permute.xlu0 %262 }
  0x8d   : > { %v267_v12 = vsel %vm266_vm3, %v263_v10, %v265_v9 }
  0x8e   : > { %467 = vmatpush3.bf16.msra.mxu0 %v249_v11 }
  0x8f   : > { %468 = vmatprep.subr.bf16.mxu0 %v533_v0 }
  0x92   : > { %469 = vmatpush3.bf16.msra.mxu0 %v267_v12 }
  0x95   : > { %471 = vmatmul.mubr.msk.bf16.vlgmr.msra.gmra.mrb[0].mxu0 %vm275_vm4, %v270_v13 }
 0x168   : > { %v313_v15 = vpop.f32.mrb[0].mxu0 }
 0x169   : > { %v326_v16 = vmul.f32 %v453_v14, %v313_v15  ;;  %v472_v17 = vpop.f32.mrb[1].mxu0 }
 0x16a   : > { %v316_v18 = vpop.f32.mrb[2].mxu0 }
 0x16b   : > { %328 = vadd.xlane.f32.xlu0 %v326_v16  ;;  %v473_v19 = vpop.f32.mrb[3].mxu0  ;;  %v331_v20 = vmul.f32 %v326_v16, %v326_v16 }
 0x16d   : > { %332 = vadd.xlane.f32.xlu1 %v331_v20 }
 0x1f8   : > { %v329_v21 = vpop.xlane.xlu0 %328 }
 0x1f9   : > { %v335_v22 = vmul.f32 0.015625, %v329_v21 }
 0x1fa   : > { %v333_v23 = vpop.xlane.xlu1 %332 }
 0x1fb   : > { %v337_v24 = vmul.f32 %v335_v22, %v335_v22  ;;  %v336_v25 = vmul.f32 0.015625, %v333_v23  ;;  %v343_v29 = vsub.f32 %v326_v16, %v335_v22 }
 0x1fd   : > { %v338_v26 = vsub.f32 %v336_v25, %v337_v24 }
 0x1ff   : > { %v339_v27 = vmax.f32 %v338_v26, 0.0 }
 0x201   : > { %v340_v28 = vadd.f32 1e-05, %v339_v27 }
 0x203   : > { %507 = vrsqrt.f32 %v340_v28 }
 0x20d   : > { %v508_v30 = vpop.eup %507 }
 0x20e   : > { %v344_v31 = vmul.f32 %v508_v30, %v343_v29 }
 0x210   : > { %vm345_vm5 = vcmp.ge.f32.partialorder %v344_v31, 0.0  ;;  %v346_v32 = vmul.f32 0.2, %v344_v31 }
 0x212   : > { %v347_v33 = vsel %vm345_vm5, %v344_v31, %v346_v32 }
 0x213   : > { %348 = vst [vmem:[%s205_s30] sm:$0xff] %v347_v33 }
 0x214 PF: > { %s13_s14 = sadd.s32 1, %s531_s14   ;;  %s605_s12 = smov %s527_s13 }
 0x215   : > { %p10_p5 = scmp.ge.s32.totalorder %s13_s14, 4   ;;  %s606_s13 = smov %s608_s15 }
 0x217   :  { %12 = sbr.rel (!%p10_p5) target bundleno = 2 (0x2), region = 65 }

</bundles_post_ra>
